<compile_context>
chip_gen: v7x
topology: tpu7x:2x2x1
jax: 0.10.0
libtpu: 0.0.40
codegen_flags: <defaults>
</compile_context>

<pallas_src>
import jax
import jax.numpy as jnp
from jax.experimental import pallas as pl
from jax.experimental.pallas import tpu as pltpu

_LANE = 128
_NEG_BIG = -1e9  # pad value for the foreground-channel logit => prob exactly 0


def _dice_kernel(pred_ref, mask_ref, out_ref, acc_fg, acc_mk, acc_ov):
    # pred_ref: (1, C, BR, 128)   mask_ref: (1, BR, 128)
    # out_ref : (1, 3, 128)  per-batch, per-lane partial sums (pred, mask, overlap)
    # acc_*   : (BR, 128) f32 running per-lane/sublane accumulators (VMEM scratch)
    s = pl.program_id(1)

    @pl.when(s == 0)
    def _init():
        acc_fg[...] = jnp.zeros_like(acc_fg)
        acc_mk[...] = jnp.zeros_like(acc_mk)
        acc_ov[...] = jnp.zeros_like(acc_ov)

    pred = pred_ref[0].astype(jnp.float32)   # (C, BR, 128)
    mask = mask_ref[0].astype(jnp.float32)   # (BR, 128)

    num_ch = pred.shape[0]
    if num_ch == 2:
        # Binary case: softmax channel 1 == sigmoid(logit1 - logit0); halves exp work.
        fg = jax.nn.sigmoid(pred[1] - pred[0])
    else:
        # Softmax over the (non-vreg) channel axis; only channel 1 is materialized.
        m = jnp.max(pred, axis=0)                        # (BR, 128) VPU max across channels
        e = jnp.exp(pred - m[None, :, :])                # (C, BR, 128)
        denom = jnp.sum(e, axis=0)                       # (BR, 128)
        fg = e[1] * pl.reciprocal(denom)                 # exact reciprocal (approx=False)

    acc_fg[...] += fg
    acc_mk[...] += mask
    acc_ov[...] += fg * mask

    @pl.when(s == pl.num_programs(1) - 1)
    def _finalize():
        out_ref[0, 0:1, :] = jnp.sum(acc_fg[...], axis=0, keepdims=True)
        out_ref[0, 1:2, :] = jnp.sum(acc_mk[...], axis=0, keepdims=True)
        out_ref[0, 2:3, :] = jnp.sum(acc_ov[...], axis=0, keepdims=True)


@jax.jit
def dice_loss(pred, masks):
    """pred: (N, C, H, W) logits (f32 or bf16); masks: (N, H, W). Returns scalar f32."""
    n, c, h, w = pred.shape
    hw = h * w

    rows = pl.cdiv(hw, _LANE)
    # ~4096 lanes (32 sublane-rows) per block: big enough to hit HBM roofline,
    # small enough to stay far below even v7x's 64 MiB VMEM with double-buffering.
    block_rows = min(32, max(8, rows))
    block_rows = pl.cdiv(block_rows, 8) * 8
    rows_pad = pl.cdiv(rows, block_rows) * block_rows
    s_pad = rows_pad * _LANE

    pred_flat = pred.reshape(n, c, hw)
    masks_flat = masks.reshape(n, hw)
    pad = s_pad - hw
    if pad:
        # Padded positions: foreground logit = -1e9 (prob -> 0), mask = 0, so they
        # contribute exactly 0 to all three sums.
        pad_pred = jnp.zeros((n, c, pad), pred.dtype)
        pad_pred = pad_pred.at[:, 1, :].set(jnp.asarray(_NEG_BIG, pred.dtype))
        pred_flat = jnp.concatenate([pred_flat, pad_pred], axis=-1)
        masks_flat = jnp.concatenate(
            [masks_flat, jnp.zeros((n, pad), masks.dtype)], axis=-1)

    pred4 = pred_flat.reshape(n, c, rows_pad, _LANE)
    masks3 = masks_flat.reshape(n, rows_pad, _LANE)

    grid = (n, rows_pad // block_rows)
    partials = pl.pallas_call(
        _dice_kernel,
        out_shape=jax.ShapeDtypeStruct((n, 3, _LANE), jnp.float32),
        grid_spec=pltpu.PrefetchScalarGridSpec(
            num_scalar_prefetch=0,
            grid=grid,
            in_specs=[
                pl.BlockSpec((1, c, block_rows, _LANE), lambda i, s: (i, 0, s, 0)),
                pl.BlockSpec((1, block_rows, _LANE), lambda i, s: (i, s, 0)),
            ],
            out_specs=pl.BlockSpec((1, 3, _LANE), lambda i, s: (i, 0, 0)),
            scratch_shapes=[pltpu.VMEM((block_rows, _LANE), jnp.float32)] * 3,
        ),
        compiler_params=pltpu.CompilerParams(
            dimension_semantics=("parallel", "arbitrary")),
    )(pred4, masks3)

    # Tiny exact reduction + loss formula in plain JAX (negligible cost).
    sums = jnp.sum(partials, axis=(0, 2))        # (3,): area_pred, area_masks, area_overlap
    return 1.0 - (2.0 * sums[2] + 1.0) / (sums[0] + sums[1] + 1.0)


def _reference(pred, masks):
    sm = jax.nn.softmax(pred, axis=1).astype(jnp.float32)
    pm = sm[:, 1, :, :]
    overlap = pm * masks
    return 1.0 - (2.0 * jnp.sum(overlap) + 1.0) / (jnp.sum(pm) + jnp.sum(masks) + 1.0)


if __name__ == "__main__":
    key = jax.random.PRNGKey(0)
    k1, k2 = jax.random.split(key)
    N, C, H, W = 2, 4, 16, 16
    pred = jax.random.normal(k1, (N, C, H, W), dtype=jnp.float32)
    masks = (jax.random.uniform(k2, (N, H, W)) > 0.5).astype(jnp.float32)

    loss = dice_loss(pred, masks)
    jax.block_until_ready(loss)

    ref = _reference(pred, masks)
    assert jnp.allclose(loss, ref, atol=1e-5, rtol=1e-5), (loss, ref)
    print("KERNEL_OK")
</pallas_src>

<mosaic_0001>
module attributes {stable_mosaic.version = 11 : i64} {
  func.func @_dice_kernel(%arg0: i32, %arg1: i32, %arg2: memref<1x4x8x128xf32, #tpu.memory_space<vmem>>, %arg3: memref<1x8x128xf32, #tpu.memory_space<vmem>>, %arg4: memref<1x3x128xf32, #tpu.memory_space<vmem>>, %arg5: memref<8x128xf32, #tpu.memory_space<vmem>>, %arg6: memref<8x128xf32, #tpu.memory_space<vmem>>, %arg7: memref<8x128xf32, #tpu.memory_space<vmem>>) attributes {dimension_semantics = [#tpu.dimension_semantics<parallel>, #tpu.dimension_semantics<arbitrary>], iteration_bounds = array<i64: 2, 1>, scalar_prefetch = 0 : i64, scratch_operands = 3 : i64, tpu.core_type = #tpu.core_type<tc>, window_params = [{transform_indices = @transform_0, window_bounds = array<i64: 1, 4, 8, 128>}, {transform_indices = @transform_1, window_bounds = array<i64: 1, 8, 128>}, {transform_indices = @transform_2, window_bounds = array<i64: 1, 3, 128>}]} {
    %c0_i32 = arith.constant 0 : i32
    %0 = arith.cmpi eq, %arg1, %c0_i32 : i32
    %1 = arith.extui %0 : i1 to i32
    %c0_i32_0 = arith.constant 0 : i32
    %2 = arith.cmpi ne, %1, %c0_i32_0 : i32
    scf.if %2 {
      %cst_22 = arith.constant 0.000000e+00 : f32
      %30 = vector.broadcast %cst_22 : f32 to vector<8x128xf32>
      %c0_23 = arith.constant 0 : index
      %c0_24 = arith.constant 0 : index
      %31 = vector.load %arg5[%c0_23, %c0_24] : memref<8x128xf32, #tpu.memory_space<vmem>>, vector<8x128xf32>
      tpu.vector_store %arg5[%c0_23, %c0_24], %30 {strides = array<i32>} : memref<8x128xf32, #tpu.memory_space<vmem>>, vector<8x128xf32>,
      %cst_25 = arith.constant 0.000000e+00 : f32
      %32 = vector.broadcast %cst_25 : f32 to vector<8x128xf32>
      %c0_26 = arith.constant 0 : index
      %c0_27 = arith.constant 0 : index
      %33 = vector.load %arg6[%c0_26, %c0_27] : memref<8x128xf32, #tpu.memory_space<vmem>>, vector<8x128xf32>
      tpu.vector_store %arg6[%c0_26, %c0_27], %32 {strides = array<i32>} : memref<8x128xf32, #tpu.memory_space<vmem>>, vector<8x128xf32>,
      %cst_28 = arith.constant 0.000000e+00 : f32
      %34 = vector.broadcast %cst_28 : f32 to vector<8x128xf32>
      %c0_29 = arith.constant 0 : index
      %c0_30 = arith.constant 0 : index
      %35 = vector.load %arg7[%c0_29, %c0_30] : memref<8x128xf32, #tpu.memory_space<vmem>>, vector<8x128xf32>
      tpu.vector_store %arg7[%c0_29, %c0_30], %34 {strides = array<i32>} : memref<8x128xf32, #tpu.memory_space<vmem>>, vector<8x128xf32>,
    } else {
    }
    %c0 = arith.constant 0 : index
    %c0_1 = arith.constant 0 : index
    %c0_2 = arith.constant 0 : index
    %c0_3 = arith.constant 0 : index
    %3 = vector.load %arg2[%c0, %c0_1, %c0_2, %c0_3] : memref<1x4x8x128xf32, #tpu.memory_space<vmem>>, vector<1x4x8x128xf32>
    %4 = vector.shape_cast %3 : vector<1x4x8x128xf32> to vector<4x8x128xf32>
    %c0_4 = arith.constant 0 : index
    %c0_5 = arith.constant 0 : index
    %c0_6 = arith.constant 0 : index
    %5 = vector.load %arg3[%c0_4, %c0_5, %c0_6] : memref<1x8x128xf32, #tpu.memory_space<vmem>>, vector<1x8x128xf32>
    %6 = vector.shape_cast %5 : vector<1x8x128xf32> to vector<8x128xf32>
    %cst = arith.constant dense<0xFF800000> : vector<8x128xf32>
    %7 = vector.multi_reduction <maximumf>, %4, %cst [0] : vector<4x8x128xf32> to vector<8x128xf32>
    %8 = vector.shape_cast %7 : vector<8x128xf32> to vector<1x8x128xf32>
    %9 = vector.broadcast %8 : vector<1x8x128xf32> to vector<4x8x128xf32>
    %10 = arith.subf %4, %9 : vector<4x8x128xf32>
    %11 = math.exp %10 : vector<4x8x128xf32>
    %cst_7 = arith.constant dense<0.000000e+00> : vector<8x128xf32>
    %12 = vector.multi_reduction <add>, %11, %cst_7 [0] : vector<4x8x128xf32> to vector<8x128xf32>
    %13 = vector.extract_strided_slice %11 {offsets = [1, 0, 0], sizes = [1, 8, 128], strides = [1, 1, 1]} : vector<4x8x128xf32> to vector<1x8x128xf32>
    %14 = vector.shape_cast %13 : vector<1x8x128xf32> to vector<8x128xf32>
    %15 = tpu.reciprocal %12 : vector<8x128xf32> -> vector<8x128xf32>
    %16 = arith.mulf %14, %15 : vector<8x128xf32>
    %c0_8 = arith.constant 0 : index
    %c0_9 = arith.constant 0 : index
    %17 = vector.load %arg5[%c0_8, %c0_9] : memref<8x128xf32, #tpu.memory_space<vmem>>, vector<8x128xf32>
    %18 = arith.addf %17, %16 : vector<8x128xf32>
    %c0_10 = arith.constant 0 : index
    %c0_11 = arith.constant 0 : index
    %19 = vector.load %arg5[%c0_10, %c0_11] : memref<8x128xf32, #tpu.memory_space<vmem>>, vector<8x128xf32>
    tpu.vector_store %arg5[%c0_10, %c0_11], %18 {strides = array<i32>} : memref<8x128xf32, #tpu.memory_space<vmem>>, vector<8x128xf32>,
    %c0_12 = arith.constant 0 : index
    %c0_13 = arith.constant 0 : index
    %20 = vector.load %arg6[%c0_12, %c0_13] : memref<8x128xf32, #tpu.memory_space<vmem>>, vector<8x128xf32>
    %21 = arith.addf %20, %6 : vector<8x128xf32>
    %c0_14 = arith.constant 0 : index
    %c0_15 = arith.constant 0 : index
    %22 = vector.load %arg6[%c0_14, %c0_15] : memref<8x128xf32, #tpu.memory_space<vmem>>, vector<8x128xf32>
    tpu.vector_store %arg6[%c0_14, %c0_15], %21 {strides = array<i32>} : memref<8x128xf32, #tpu.memory_space<vmem>>, vector<8x128xf32>,
    %c0_16 = arith.constant 0 : index
    %c0_17 = arith.constant 0 : index
    %23 = vector.load %arg7[%c0_16, %c0_17] : memref<8x128xf32, #tpu.memory_space<vmem>>, vector<8x128xf32>
    %24 = arith.mulf %16, %6 : vector<8x128xf32>
    %25 = arith.addf %23, %24 : vector<8x128xf32>
    %c0_18 = arith.constant 0 : index
    %c0_19 = arith.constant 0 : index
    %26 = vector.load %arg7[%c0_18, %c0_19] : memref<8x128xf32, #tpu.memory_space<vmem>>, vector<8x128xf32>
    tpu.vector_store %arg7[%c0_18, %c0_19], %25 {strides = array<i32>} : memref<8x128xf32, #tpu.memory_space<vmem>>, vector<8x128xf32>,
    %c0_i32_20 = arith.constant 0 : i32
    %27 = arith.cmpi eq, %arg1, %c0_i32_20 : i32
    %28 = arith.extui %27 : i1 to i32
    %c0_i32_21 = arith.constant 0 : i32
    %29 = arith.cmpi ne, %28, %c0_i32_21 : i32
    scf.if %29 {
      %c0_22 = arith.constant 0 : index
      %c0_23 = arith.constant 0 : index
      %30 = vector.load %arg5[%c0_22, %c0_23] : memref<8x128xf32, #tpu.memory_space<vmem>>, vector<8x128xf32>
      %cst_24 = arith.constant dense<0.000000e+00> : vector<128xf32>
      %31 = vector.multi_reduction <add>, %30, %cst_24 [0] : vector<8x128xf32> to vector<128xf32>
      %32 = vector.shape_cast %31 : vector<128xf32> to vector<1x128xf32>
      %c0_25 = arith.constant 0 : index
      %c0_26 = arith.constant 0 : index
      %c0_27 = arith.constant 0 : index
      %33 = vector.load %arg4[%c0_25, %c0_26, %c0_27] : memref<1x3x128xf32, #tpu.memory_space<vmem>>, vector<1x1x128xf32>
      %34 = vector.shape_cast %33 : vector<1x1x128xf32> to vector<1x128xf32>
      %35 = vector.shape_cast %32 : vector<1x128xf32> to vector<1x1x128xf32>
      tpu.vector_store %arg4[%c0_25, %c0_26, %c0_27], %35 {strides = array<i32>} : memref<1x3x128xf32, #tpu.memory_space<vmem>>, vector<1x1x128xf32>,
      %c0_28 = arith.constant 0 : index
      %c0_29 = arith.constant 0 : index
      %36 = vector.load %arg6[%c0_28, %c0_29] : memref<8x128xf32, #tpu.memory_space<vmem>>, vector<8x128xf32>
      %cst_30 = arith.constant dense<0.000000e+00> : vector<128xf32>
      %37 = vector.multi_reduction <add>, %36, %cst_30 [0] : vector<8x128xf32> to vector<128xf32>
      %38 = vector.shape_cast %37 : vector<128xf32> to vector<1x128xf32>
      %c0_31 = arith.constant 0 : index
      %c1 = arith.constant 1 : index
      %c0_32 = arith.constant 0 : index
      %39 = vector.load %arg4[%c0_31, %c1, %c0_32] : memref<1x3x128xf32, #tpu.memory_space<vmem>>, vector<1x1x128xf32>
      %40 = vector.shape_cast %39 : vector<1x1x128xf32> to vector<1x128xf32>
      %41 = vector.shape_cast %38 : vector<1x128xf32> to vector<1x1x128xf32>
      tpu.vector_store %arg4[%c0_31, %c1, %c0_32], %41 {strides = array<i32>} : memref<1x3x128xf32, #tpu.memory_space<vmem>>, vector<1x1x128xf32>,
      %c0_33 = arith.constant 0 : index
      %c0_34 = arith.constant 0 : index
      %42 = vector.load %arg7[%c0_33, %c0_34] : memref<8x128xf32, #tpu.memory_space<vmem>>, vector<8x128xf32>
      %cst_35 = arith.constant dense<0.000000e+00> : vector<128xf32>
      %43 = vector.multi_reduction <add>, %42, %cst_35 [0] : vector<8x128xf32> to vector<128xf32>
      %44 = vector.shape_cast %43 : vector<128xf32> to vector<1x128xf32>
      %c0_36 = arith.constant 0 : index
      %c2 = arith.constant 2 : index
      %c0_37 = arith.constant 0 : index
      %45 = vector.load %arg4[%c0_36, %c2, %c0_37] : memref<1x3x128xf32, #tpu.memory_space<vmem>>, vector<1x1x128xf32>
      %46 = vector.shape_cast %45 : vector<1x1x128xf32> to vector<1x128xf32>
      %47 = vector.shape_cast %44 : vector<1x128xf32> to vector<1x1x128xf32>
      tpu.vector_store %arg4[%c0_36, %c2, %c0_37], %47 {strides = array<i32>} : memref<1x3x128xf32, #tpu.memory_space<vmem>>, vector<1x1x128xf32>,
    } else {
    }
    return
  }
  func.func @transform_0(%arg0: i32, %arg1: i32) -> (i32, i32, i32, i32) {
    %c0_i32 = arith.constant 0 : i32
    %c0_i32_0 = arith.constant 0 : i32
    %c0_i32_1 = arith.constant 0 : i32
    return %arg0, %c0_i32, %arg1, %c0_i32_0 : i32, i32, i32, i32
  }
  func.func @transform_1(%arg0: i32, %arg1: i32) -> (i32, i32, i32) {
    %c0_i32 = arith.constant 0 : i32
    %c0_i32_0 = arith.constant 0 : i32
    return %arg0, %arg1, %c0_i32 : i32, i32, i32
  }
  func.func @transform_2(%arg0: i32, %arg1: i32) -> (i32, i32, i32) {
    %c0_i32 = arith.constant 0 : i32
    %c0_i32_0 = arith.constant 0 : i32
    %c0_i32_1 = arith.constant 0 : i32
    return %arg0, %c0_i32, %c0_i32_0 : i32, i32, i32
  }
}

</mosaic_0001>

<bundles_post_ra>
// kernel: dice_loss.1
= control target key start
LH: loop header
LB: loop body
LE: loop exit
PB: predicated region body
PF: predicated region fallthrough
CT: control target
= control target key end

     0   :  { %s429_s9 = smov 0   ;;  %s431_s10 = smov 0   ;;  %s470_s0 = inlined_call_operand.vmem [shape: f32[2,4,8,128], index: 0, kind: input, shape index: {}]   ;;  %s471_s1 = inlined_call_operand.vmem [shape: f32[2,8,128], index: 1, kind: input, shape index: {}]   ;;  %s472_s2 = inlined_call_operand.vmem [shape: f32[2,3,128], index: 2, kind: output, shape index: {}]  }
   0x1   :  { %s433_s11 = smov 0  }
   0x2 LB: > { %s24_s12 = sadd.s32 1, %s408_s10  ;;  %p348_p0 = scmp.ge.s32.totalorder %s412_s11, 1  ;;  %s412_s11 = sphi %s433_s11, %s12_s11   ;;  %s408_s10 = sphi %s431_s10, %s474_s10   ;;  %s404_s9 = sphi %s429_s9, %s473_s9  }
   0x3   : > { %p26_p1 = scmp.ge.s32.totalorder %s24_s12, 2  ;;  %p143_p2 = scmp.lt.s32.totalorder %s412_s11, 3 }
   0x5   : > { %s476_s12 = smov (%p26_p1, %s24_s12), 0  ;;  %p144_p3 = pnand %p348_p0, %p143_p2 }
   0x6   : > { %p174_p4 = scmp.lt.s32.totalorder (!%p144_p3), %s404_s9, 1 }
   0x7   : > { %147 = sbr.rel (%p144_p3) target bundleno = 73 (0x49), region = 28 }
   0xe   : > { %s478_s9 = smov (!%p174_p4, %s404_s9), 1 }
   0xf   : > { %s355_s13 = sshll.u32 %s478_s9, 5  ;;  %s351_s17 = sshll.u32 %s478_s9, 3 }
  0x10   : > { %s181_s16 = scalar_lea.vmem %s470_s0, %s355_s13  ;;  %s188_s20 = scalar_lea.vmem %s471_s1, %s351_s17 }
  0x11   : > { %v200_v0 = vld [vmem:[%s181_s16] sm:$0xff]  ;;  %v201_v1 = vld [vmem:[%s181_s16 + $0x8] sm:$0xff]  ;;  %v202_v2 = vld [vmem:[%s181_s16 + $0x10] sm:$0xff]  ;;  %s352_s21 = sshll.u32 %s478_s9, 2 }
  0x12   : > { %v203_v3 = vld [vmem:[%s181_s16 + $0x18] sm:$0xff]  ;;  %v205_v4 = vmax.f32 %v200_v0, %v201_v1  ;;  %v204_v6 = vld [vmem:[%s188_s20] sm:$0xff]  ;;  %s192_s24 = scalar_lea.vmem %s472_s2, %s352_s21 }
  0x13   : > { %v206_v5 = vmax.f32 %v202_v2, %v203_v3  ;;  %v247_v7 = vrot.slane %v204_v6, 4 }
  0x15   : > { %v207_v8 = vmax.f32 %v205_v4, %v206_v5  ;;  %v248_v9 = vadd.f32 %v247_v7, %v204_v6 }
  0x17   : > { %v208_v10 = vsub.f32 %v200_v0, %v207_v8  ;;  %v209_v11 = vsub.f32 %v201_v1, %v207_v8  ;;  %v210_v12 = vsub.f32 %v202_v2, %v207_v8  ;;  %v211_v13 = vsub.f32 %v203_v3, %v207_v8 }
  0x18   : > { %v249_v14 = vrot.slane %v248_v9, 2 }
  0x19   : > { %v212_v15 = vmul.f32 1.442695, %v208_v10  ;;  %v214_v16 = vmul.f32 1.442695, %v209_v11  ;;  %v216_v17 = vmul.f32 1.442695, %v210_v12 }
  0x1a   : > { %v218_v18 = vmul.f32 1.442695, %v211_v13  ;;  %v250_v19 = vadd.f32 %v249_v14, %v248_v9 }
  0x1b   : > { %380 = vpow2.f32 %v212_v15 }
  0x1c   : > { %382 = vpow2.f32 %v214_v16  ;;  %v251_v20 = vrot.slane %v250_v19, 1 }
  0x1d   : > { %384 = vpow2.f32 %v216_v17 }
  0x1e   : > { %386 = vpow2.f32 %v218_v18  ;;  %v252_v21 = vadd.f32 %v251_v20, %v250_v19 }
  0x20   : > { %253 = vst [vmem:[%s192_s24 + $0x1] sm:$0x1] %v252_v21 }
  0x25   : > { %v381_v22 = vpop.eup %380 }
  0x26   : > { %v383_v23 = vpop.eup %382 }
  0x27   : > { %v385_v24 = vpop.eup %384  ;;  %v220_v25 = vadd.f32 %v383_v23, %v381_v22 }
  0x28   : > { %v387_v26 = vpop.eup %386 }
  0x29   : > { %v221_v27 = vadd.f32 %v385_v24, %v220_v25 }
  0x2b   : > { %v222_v28 = vadd.f32 %v387_v26, %v221_v27 }
  0x2d   : > { %388 = vrcp.f32 %v222_v28 }
  0x37   : > { %v389_v29 = vpop.eup %388 }
  0x38   : > { %v224_v30 = vmul.f32 %v389_v29, %v383_v23 }
  0x3a   : > { %v239_v31 = vrot.slane %v224_v30, 4  ;;  %v232_v32 = vmul.f32 %v224_v30, %v204_v6 }
  0x3c   : > { %v240_v33 = vadd.f32 %v239_v31, %v224_v30  ;;  %v255_v34 = vrot.slane %v232_v32, 4 }
  0x3e   : > { %v241_v35 = vrot.slane %v240_v33, 2  ;;  %v256_v36 = vadd.f32 %v255_v34, %v232_v32 }
  0x40   : > { %v242_v37 = vadd.f32 %v241_v35, %v240_v33  ;;  %v257_v38 = vrot.slane %v256_v36, 2 }
  0x42   : > { %v243_v39 = vrot.slane %v242_v37, 1  ;;  %v258_v40 = vadd.f32 %v257_v38, %v256_v36 }
  0x44   : > { %v244_v41 = vadd.f32 %v243_v39, %v242_v37  ;;  %v259_v42 = vrot.slane %v258_v40, 1 }
  0x46   : > { %245 = vst [vmem:[%s192_s24] sm:$0x1] %v244_v41  ;;  %v260_v43 = vadd.f32 %v259_v42, %v258_v40 }
  0x48   : > { %261 = vst [vmem:[%s192_s24 + $0x2] sm:$0x1] %v260_v43 }
  0x49 PF: > { %s12_s11 = sadd.s32 1, %s412_s11   ;;  %s473_s9 = smov %s408_s10 }
  0x4a   : > { %p9_p5 = scmp.ge.s32.totalorder %s12_s11, 4   ;;  %s474_s10 = smov %s476_s12 }
  0x4c   :  { %11 = sbr.rel (!%p9_p5) target bundleno = 2 (0x2), region = 69 }

</bundles_post_ra>
